<compile_context>
chip_gen: v6e
topology: v6e:2x2x1
jax: 0.10.0
libtpu: 0.0.40
codegen_flags: <defaults>
</compile_context>

<pallas_src>
import functools

import jax
import jax.numpy as jnp
import numpy as np
from jax.experimental import pallas as pl
from jax.experimental.pallas import tpu as pltpu


def _round_up(v, m):
    return ((v + m - 1) // m) * m


def _cdiv(a, b):
    return -(-a // b)


def _semidual_min_kernel(xa_ref, yt_ref, o_ref, minacc_ref, *, lane_tiles):
    """One (i, j) grid step.

    xa_ref     : (tn, D_aug) augmented x tile (resident across j)
    yt_ref     : (D_aug, tm) augmented y^T tile: [-2*y^T ; y2 - psi ; 0]
    o_ref      : (tn, 1)     per-row min of (-2<x,y> + ||y||^2 - psi)
    minacc_ref : (tn, 128)   VMEM running elementwise min, float32
    """
    j = pl.program_id(1)

    @pl.when(j == 0)
    def _init():
        minacc_ref[...] = jnp.full(minacc_ref.shape, jnp.inf, dtype=jnp.float32)

    # Single MXU contraction does scale + bias + matmul (f32 accumulation).
    s = jnp.dot(xa_ref[...], yt_ref[...],
                preferred_element_type=jnp.float32)          # (tn, tm)

    # Elementwise (VALU) fold into 128 lanes; lane-tile-aligned slices are
    # layout-preserving, so no relayout / XLU work here.
    mins = minacc_ref[...]
    for k in range(lane_tiles):
        mins = jnp.minimum(mins, s[:, k * 128:(k + 1) * 128])
    minacc_ref[...] = mins

    @pl.when(j == pl.num_programs(1) - 1)
    def _finalize():
        # One cross-lane (XLU) reduction per i-tile.
        o_ref[...] = jnp.min(minacc_ref[...], axis=1, keepdims=True)


def semidual_forward(inputx, inputy, psi, *, tn=1024, tm=2048):
    """Pallas equivalent of semidual.forward (usekeops=False).

    inputx: (N, D), inputy: (M, D), psi: (M,).
    Returns (psi_conjugate_mean, psi_mean).
    """
    N, D = inputx.shape
    M, Dy = inputy.shape
    assert D == Dy, (D, Dy)
    assert psi.shape == (M,), psi.shape

    # Clamp tile sizes to the problem size and force (8, 128) alignment.
    tn = max(8, _round_up(min(tn, _round_up(N, 8)), 8))
    tm = max(128, _round_up(min(tm, _round_up(M, 128)), 128))

    # v7x megacore: try to make the number of i-tiles even (>= 2 when N allows)
    # so the "parallel" row axis splits across both TensorCores.
    n8 = _round_up(N, 8)
    num_i = _cdiv(n8, tn)
    if num_i == 1 and n8 >= 16:
        tn = _round_up(_cdiv(n8, 2), 8)
    elif num_i > 1 and num_i % 2 == 1:
        tn = _round_up(_cdiv(n8, num_i + 1), 8)

    Np = _round_up(N, tn)
    Mp = _round_up(M, tm)
    D_aug = _round_up(D + 1, 8)

    f32 = jnp.float32
    xf = inputx.astype(f32)
    yf = inputy.astype(f32)
    psif = psi.astype(f32)

    # ||x||^2 does not change the argmin; added back after the kernel (exact).
    x2 = jnp.sum(xf * xf, axis=1)                                  # (N,)

    # Augmented operands (module __init__ style precomputation).
    x_aug = jnp.concatenate([xf, jnp.ones((N, 1), f32)], axis=1)   # (N, D+1)
    x_aug = jnp.pad(x_aug, ((0, Np - N), (0, D_aug - (D + 1))))    # (Np, D_aug)

    y2 = jnp.sum(yf * yf, axis=1)                                  # (M,)
    yt_aug = jnp.concatenate([-2.0 * yf.T, (y2 - psif)[None, :]], axis=0)
    yt_aug = jnp.pad(yt_aug, ((0, D_aug - (D + 1)), (0, Mp - M)))  # (D_aug, Mp)
    if Mp != M:
        # Padded y columns get a huge bias so they can never win the min.
        yt_aug = yt_aug.at[D, M:].set(jnp.asarray(1e30, f32))

    grid = (Np // tn, Mp // tm)
    kernel = functools.partial(_semidual_min_kernel, lane_tiles=tm // 128)

    row_min = pl.pallas_call(
        kernel,
        out_shape=jax.ShapeDtypeStruct((Np, 1), jnp.float32),
        grid_spec=pltpu.PrefetchScalarGridSpec(
            num_scalar_prefetch=0,
            grid=grid,
            in_specs=[
                pl.BlockSpec((tn, D_aug), lambda i, j: (i, 0)),   # x_aug tile
                pl.BlockSpec((D_aug, tm), lambda i, j: (0, j)),   # yt_aug tile
            ],
            out_specs=pl.BlockSpec((tn, 1), lambda i, j: (i, 0)),
            scratch_shapes=[pltpu.VMEM((tn, 128), jnp.float32)],
        ),
        compiler_params=pltpu.CompilerParams(
            dimension_semantics=("parallel", "arbitrary"),
            vmem_limit_bytes=32 * 1024 * 1024),
    )(x_aug, yt_aug)

    # Tiny O(N) / O(M) scalar reductions in the wrapper.
    psi_conjugate_mean = jnp.mean(row_min[:N, 0] + x2)
    psi_mean = jnp.mean(psi)
    return psi_conjugate_mean, psi_mean


def _numpy_reference(x, y, psi):
    xn = np.asarray(x, dtype=np.float64)
    yn = np.asarray(y, dtype=np.float64)
    pn = np.asarray(psi, dtype=np.float64)
    cxy = ((xn ** 2).sum(1, keepdims=True) + (yn ** 2).sum(1)[None, :]
           - 2.0 * xn @ yn.T)
    psi_conjugate_mean = (cxy - pn[None, :]).min(axis=1).mean()
    return psi_conjugate_mean, pn.mean()


if __name__ == "__main__":
    key = jax.random.PRNGKey(0)
    kx, ky, kpsi = jax.random.split(key, 3)

    # Point-cloud shapes typical of wgenpatex patches: D = C * p * p = 3*4*4.
    # N, M deliberately non tile-aligned to exercise the padding paths.
    N, M, D = 200, 300, 48
    x = jax.random.normal(kx, (N, D), dtype=jnp.float32)
    y = jax.random.normal(ky, (M, D), dtype=jnp.float32)

    test_psis = [
        jnp.zeros((M,), jnp.float32),                              # module init
        0.1 * jax.random.normal(kpsi, (M,), dtype=jnp.float32),    # "trained" psi
    ]
    # Default (large) tiles; small tiles (multi-j reduction path, 1 lane-tile
    # fold); mid tiles (2 lane-tile fold, 2 j-tiles).
    tile_configs = [(1024, 2048), (128, 128), (512, 256)]

    for psi in test_psis:
        ref_conj, ref_psi_mean = _numpy_reference(x, y, psi)
        for (tn, tm) in tile_configs:
            out = semidual_forward(x, y, psi, tn=tn, tm=tm)
            out = jax.block_until_ready(out)
            np.testing.assert_allclose(float(out[0]), ref_conj,
                                       rtol=1e-3, atol=1e-3)
            np.testing.assert_allclose(float(out[1]), ref_psi_mean,
                                       rtol=1e-5, atol=1e-6)

    # TODO(synk): usekeops=True (KeOps LazyTensor) branch not separately
    # implemented; it computes the same quantities as the dense branch above.
    print("KERNEL_OK")
</pallas_src>

<mosaic_0001>
module attributes {stable_mosaic.version = 11 : i64} {
  func.func @_semidual_min_kernel(%arg0: i32, %arg1: i32, %arg2: memref<104x56xf32, #tpu.memory_space<vmem>>, %arg3: memref<56x384xf32, #tpu.memory_space<vmem>>, %arg4: memref<104x1xf32, #tpu.memory_space<vmem>>, %arg5: memref<104x128xf32, #tpu.memory_space<vmem>>) attributes {dimension_semantics = [#tpu.dimension_semantics<parallel>, #tpu.dimension_semantics<arbitrary>], iteration_bounds = array<i64: 2, 1>, scalar_prefetch = 0 : i64, scratch_operands = 1 : i64, tpu.core_type = #tpu.core_type<tc>, window_params = [{transform_indices = @transform_0, window_bounds = array<i64: 104, 56>}, {transform_indices = @transform_1, window_bounds = array<i64: 56, 384>}, {transform_indices = @transform_2, window_bounds = array<i64: 104, 1>}]} {
    %c0_i32 = arith.constant 0 : i32
    %0 = arith.cmpi eq, %arg1, %c0_i32 : i32
    %1 = arith.extui %0 : i1 to i32
    %c0_i32_0 = arith.constant 0 : i32
    %2 = arith.cmpi ne, %1, %c0_i32_0 : i32
    scf.if %2 {
      %cst_10 = arith.constant 0x7F800000 : f32
      %17 = vector.broadcast %cst_10 : f32 to vector<104x128xf32>
      %c0_11 = arith.constant 0 : index
      %c0_12 = arith.constant 0 : index
      %18 = vector.load %arg5[%c0_11, %c0_12] : memref<104x128xf32, #tpu.memory_space<vmem>>, vector<104x128xf32>
      tpu.vector_store %arg5[%c0_11, %c0_12], %17 {strides = array<i32>} : memref<104x128xf32, #tpu.memory_space<vmem>>, vector<104x128xf32>,
    } else {
    }
    %c0 = arith.constant 0 : index
    %c0_1 = arith.constant 0 : index
    %3 = vector.load %arg2[%c0, %c0_1] : memref<104x56xf32, #tpu.memory_space<vmem>>, vector<104x56xf32>
    %c0_2 = arith.constant 0 : index
    %c0_3 = arith.constant 0 : index
    %4 = vector.load %arg3[%c0_2, %c0_3] : memref<56x384xf32, #tpu.memory_space<vmem>>, vector<56x384xf32>
    %cst = arith.constant dense<0.000000e+00> : vector<104x384xf32>
    %5 = tpu.matmul %3, %4, %cst {dimension_numbers = #tpu.dot_dimension_numbers<[1], [0], [0], [1], [0, 0, 1, 1], [], []>} : vector<104x56xf32>, vector<56x384xf32>, vector<104x384xf32> -> vector<104x384xf32>
    %c0_4 = arith.constant 0 : index
    %c0_5 = arith.constant 0 : index
    %6 = vector.load %arg5[%c0_4, %c0_5] : memref<104x128xf32, #tpu.memory_space<vmem>>, vector<104x128xf32>
    %7 = vector.extract_strided_slice %5 {offsets = [0, 0], sizes = [104, 128], strides = [1, 1]} : vector<104x384xf32> to vector<104x128xf32>
    %8 = arith.minimumf %6, %7 : vector<104x128xf32>
    %9 = vector.extract_strided_slice %5 {offsets = [0, 128], sizes = [104, 128], strides = [1, 1]} : vector<104x384xf32> to vector<104x128xf32>
    %10 = arith.minimumf %8, %9 : vector<104x128xf32>
    %11 = vector.extract_strided_slice %5 {offsets = [0, 256], sizes = [104, 128], strides = [1, 1]} : vector<104x384xf32> to vector<104x128xf32>
    %12 = arith.minimumf %10, %11 : vector<104x128xf32>
    %c0_6 = arith.constant 0 : index
    %c0_7 = arith.constant 0 : index
    %13 = vector.load %arg5[%c0_6, %c0_7] : memref<104x128xf32, #tpu.memory_space<vmem>>, vector<104x128xf32>
    tpu.vector_store %arg5[%c0_6, %c0_7], %12 {strides = array<i32>} : memref<104x128xf32, #tpu.memory_space<vmem>>, vector<104x128xf32>,
    %c0_i32_8 = arith.constant 0 : i32
    %14 = arith.cmpi eq, %arg1, %c0_i32_8 : i32
    %15 = arith.extui %14 : i1 to i32
    %c0_i32_9 = arith.constant 0 : i32
    %16 = arith.cmpi ne, %15, %c0_i32_9 : i32
    scf.if %16 {
      %c0_10 = arith.constant 0 : index
      %c0_11 = arith.constant 0 : index
      %17 = vector.load %arg5[%c0_10, %c0_11] : memref<104x128xf32, #tpu.memory_space<vmem>>, vector<104x128xf32>
      %cst_12 = arith.constant dense<0x7F800000> : vector<104xf32>
      %18 = vector.multi_reduction <minimumf>, %17, %cst_12 [1] : vector<104x128xf32> to vector<104xf32>
      %19 = vector.shape_cast %18 : vector<104xf32> to vector<104x1xf32>
      %c0_13 = arith.constant 0 : index
      %c0_14 = arith.constant 0 : index
      %20 = vector.load %arg4[%c0_13, %c0_14] : memref<104x1xf32, #tpu.memory_space<vmem>>, vector<104x1xf32>
      tpu.vector_store %arg4[%c0_13, %c0_14], %19 {strides = array<i32>} : memref<104x1xf32, #tpu.memory_space<vmem>>, vector<104x1xf32>,
    } else {
    }
    return
  }
  func.func @transform_0(%arg0: i32, %arg1: i32) -> (i32, i32) {
    %c0_i32 = arith.constant 0 : i32
    %c0_i32_0 = arith.constant 0 : i32
    return %arg0, %c0_i32 : i32, i32
  }
  func.func @transform_1(%arg0: i32, %arg1: i32) -> (i32, i32) {
    %c0_i32 = arith.constant 0 : i32
    %c0_i32_0 = arith.constant 0 : i32
    return %c0_i32, %arg1 : i32, i32
  }
  func.func @transform_2(%arg0: i32, %arg1: i32) -> (i32, i32) {
    %c0_i32 = arith.constant 0 : i32
    %c0_i32_0 = arith.constant 0 : i32
    return %arg0, %c0_i32 : i32, i32
  }
}

</mosaic_0001>

<bundles_post_ra>
// kernel: tpu_custom_call.1
= control target key start
LH: loop header
LB: loop body
LE: loop exit
PB: predicated region body
PF: predicated region fallthrough
CT: control target
= control target key end

     0   :  { %s922_s9 = smov 0   ;;  %s924_s10 = smov 0   ;;  %s1128_s0 = inlined_call_operand.vmem [shape: f32[208,56], index: 0, kind: input, shape index: {}]   ;;  %s1129_s1 = inlined_call_operand.vmem [shape: f32[56,384], index: 1, kind: input, shape index: {}]   ;;  %s1130_s2 = inlined_call_operand.vmem [shape: f32[208,1], index: 2, kind: output, shape index: {}]  }
   0x1   :  { %s926_s11 = smov 0  }
   0x2 LB: > { %s24_s12 = sadd.s32 1, %s899_s10  ;;  %p751_p0 = scmp.ge.s32.totalorder %s903_s11, 1  ;;  %s903_s11 = sphi %s926_s11, %s12_s11   ;;  %s899_s10 = sphi %s924_s10, %s1132_s10   ;;  %s895_s9 = sphi %s922_s9, %s1131_s9  }
   0x3   : > { %p26_p1 = scmp.ge.s32.totalorder %s24_s12, 2  ;;  %p136_p2 = scmp.lt.s32.totalorder %s903_s11, 3 }
   0x5   : > { %s1134_s12 = smov (%p26_p1, %s24_s12), 0  ;;  %p137_p3 = pnand %p751_p0, %p136_p2 }
   0x6   : > { %s163_s19 = smul.u32 (!%p137_p3), 13, %s895_s9 }
   0x7   : > { %140 = sbr.rel (%p137_p3) target bundleno = 413 (0x19d), region = 28 }
   0x8   : > { %p164_p4 = scmp.lt.s32.totalorder (!%p137_p3), %s163_s19, 25 }
   0xc   : > { %v230_v0 = vld [vmem:[%s1129_s1 + $0x98] sm:$0xff]  ;;  %v229_v1 = vld [vmem:[%s1129_s1 + $0x90] sm:$0xff]  ;;  %v227_v2 = vld [vmem:[%s1129_s1 + $0x80] sm:$0xff]  ;;  %v905_v3 = vmov 0.0   ;;  %s1136_s19 = smov (!%p164_p4, %s163_s19), 25  ;;  %vm232_vm0 = vcmask 457728  }
   0xd   : > { %290 = vmatprep.subr.mxu0 %v230_v0  ;;  %802 = vmatprep.subr.mxu1 %v905_v3  ;;  %v226_v4 = vld [vmem:[%s1129_s1 + $0x78] sm:$0xff]  ;;  %v231_v5 = vld [vmem:[%s1129_s1 + $0xa0] sm:$0xff]  ;;  %v224_v6 = vld [vmem:[%s1129_s1 + $0x68] sm:$0xff]  ;;  %s752_s15 = sshll.u32 %s1136_s19, 3  ;;  %vm906_vm1 = vmmov 0   ;;  %vm652_vm2 = vcmask 7168  }
   0xe   : > { %291 = vmatpush1.msra.mxu0 %v229_v1  ;;  %803 = vmatpush3.msra.mxu1 %v231_v5  ;;  %v228_v7 = vld [vmem:[%s1129_s1 + $0x88] sm:$0xff]  ;;  %v223_v8 = vld [vmem:[%s1129_s1 + $0x60] sm:$0xff]  ;;  %v225_v9 = vld [vmem:[%s1129_s1 + $0x70] sm:$0xff]  ;;  %s1007_s27 = scalar_lea.vmem %s1128_s0, %s752_s15  ;;  %s179_s13 = scalar_lea.vmem %s1130_s2, %s752_s15 }
   0xf   : > { %292 = vmatprep.subr.mxu0 %v227_v2  ;;  %804 = vmatprep.subr.mxu1 %v905_v3  ;;  %v221_v10 = vld [vmem:[%s1129_s1 + $0x50] sm:$0xff]  ;;  %v220_v11 = vld [vmem:[%s1129_s1 + $0x48] sm:$0xff]  ;;  %v222_v12 = vld [vmem:[%s1129_s1 + $0x58] sm:$0xff] }
  0x10   : > { %293 = vmatpush1.msra.mxu0 %v226_v4  ;;  %805 = vmatpush3.msra.mxu1 %v228_v7  ;;  %v218_v13 = vld [vmem:[%s1129_s1 + $0x38] sm:$0xff]  ;;  %v217_v14 = vld [vmem:[%s1129_s1 + $0x30] sm:$0xff]  ;;  %v219_v15 = vld [vmem:[%s1129_s1 + $0x40] sm:$0xff] }
  0x11   : > { %294 = vmatprep.subr.mxu0 %v224_v6  ;;  %806 = vmatprep.subr.mxu1 %v905_v3  ;;  %v215_v16 = vld [vmem:[%s1129_s1 + $0x20] sm:$0xff]  ;;  %v214_v17 = vld [vmem:[%s1129_s1 + $0x18] sm:$0xff]  ;;  %v212_v18 = vld [vmem:[%s1129_s1 + $0x8] sm:$0xff] }
  0x12   : > { %295 = vmatpush1.msra.mxu0 %v223_v8  ;;  %807 = vmatpush3.msra.mxu1 %v225_v9  ;;  %v216_v19 = vld [vmem:[%s1129_s1 + $0x28] sm:$0xff]  ;;  %v211_v20 = vld [vmem:[%s1129_s1] sm:$0xff]  ;;  %v213_v22 = vld [vmem:[%s1129_s1 + $0x10] sm:$0xff] }
  0x13   : > { %296 = vmatprep.subr.mxu0 %v221_v10  ;;  %808 = vmatprep.subr.mxu1 %v905_v3  ;;  %v198_v21 = vld [vmem:[%s1007_s27] sm:$0xff]  ;;  %v199_v23 = vld [vmem:[%s1007_s27 + $0x8] sm:$0xff]  ;;  %v200_v24 = vld [vmem:[%s1007_s27 + $0x10] sm:$0xff] }
  0x14   : > { %297 = vmatpush1.msra.mxu0 %v220_v11  ;;  %809 = vmatpush3.msra.mxu1 %v222_v12  ;;  %v201_v25 = vld [vmem:[%s1007_s27 + $0x18] sm:$0xff]  ;;  %v202_v26 = vld [vmem:[%s1007_s27 + $0x20] sm:$0xff]  ;;  %v203_v27 = vld [vmem:[%s1007_s27 + $0x28] sm:$0xff] }
  0x15   : > { %298 = vmatprep.subr.mxu0 %v218_v13  ;;  %810 = vmatprep.subr.mxu1 %v905_v3  ;;  %v204_v28 = vld [vmem:[%s1007_s27 + $0x30] sm:$0xff]  ;;  %v205_v29 = vld [vmem:[%s1007_s27 + $0x38] sm:$0xff]  ;;  %v206_v30 = vld [vmem:[%s1007_s27 + $0x40] sm:$0xff] }
  0x16   : > { %299 = vmatpush1.msra.mxu0 %v217_v14  ;;  %811 = vmatpush3.msra.mxu1 %v219_v15  ;;  %v207_v31 = vld [vmem:[%s1007_s27 + $0x48] sm:$0xff]  ;;  %v208_v32 = vld [vmem:[%s1007_s27 + $0x50] sm:$0xff]  ;;  %v209_v33 = vld [vmem:[%s1007_s27 + $0x58] sm:$0xff] }
  0x17   : > { %300 = vmatprep.subr.mxu0 %v215_v16  ;;  %812 = vmatprep.subr.mxu1 %v905_v3  ;;  %v210_v34 = vld [vmem:[%s1007_s27 + $0x60] sm:$0xff] }
  0x18   : > { %301 = vmatpush1.msra.mxu0 %v214_v17  ;;  %336 = vmatprep.mubr.f32.mxu0 %v905_v3 }
  0x19   : > { %302 = vmatprep.subr.mxu0 %v212_v18  ;;  %813 = vmatpush3.msra.mxu1 %v216_v19 }
  0x1a   : > { %303 = vmatpush1.msra.mxu0 %v211_v20  ;;  %814 = vmatprep.subr.mxu1 %v905_v3 }
  0x1b   : > { %754 = vmatmul.mubr.msk.f32.vlgmr.msra.gmra.mxu0 %vm232_vm0, %v198_v21  ;;  %815 = vmatpush3.msra.mxu1 %v213_v22 }
  0x1c   : > { %816 = vmatprep.mubr.msk.f32.mxu1 %vm906_vm1, %v905_v3  ;;  %342 = vmatprep.mubr.f32.mxu0 %v905_v3 }
  0x1d   : > { %817 = vmatmul.mubr.msk.f32.vlgmr.msra.gmra.mxu1 %vm232_vm0, %v198_v21 }
  0x1e   : > { %819 = vmatprep.mubr.msk.f32.mxu1 %vm906_vm1, %v905_v3 }
  0x1f   : > { %755 = vmatmul.mubr.msk.f32.gmra.mxu0 %vm232_vm0, %v199_v23 }
  0x20   : > { %348 = vmatprep.mubr.f32.mxu0 %v905_v3 }
  0x21   : > { %820 = vmatmul.mubr.msk.f32.gmra.mxu1 %vm232_vm0, %v199_v23 }
  0x22   : > { %822 = vmatprep.mubr.msk.f32.mxu1 %vm906_vm1, %v905_v3 }
  0x23   : > { %756 = vmatmul.mubr.msk.f32.gmra.mxu0 %vm232_vm0, %v200_v24 }
  0x24   : > { %354 = vmatprep.mubr.f32.mxu0 %v905_v3 }
  0x25   : > { %823 = vmatmul.mubr.msk.f32.gmra.mxu1 %vm232_vm0, %v200_v24 }
  0x26   : > { %825 = vmatprep.mubr.msk.f32.mxu1 %vm906_vm1, %v905_v3 }
  0x27   : > { %757 = vmatmul.mubr.msk.f32.gmra.mxu0 %vm232_vm0, %v201_v25 }
  0x28   : > { %360 = vmatprep.mubr.f32.mxu0 %v905_v3 }
  0x29   : > { %826 = vmatmul.mubr.msk.f32.gmra.mxu1 %vm232_vm0, %v201_v25 }
  0x2a   : > { %828 = vmatprep.mubr.msk.f32.mxu1 %vm906_vm1, %v905_v3 }
  0x2b   : > { %758 = vmatmul.mubr.msk.f32.gmra.mxu0 %vm232_vm0, %v202_v26 }
  0x2c   : > { %366 = vmatprep.mubr.f32.mxu0 %v905_v3 }
  0x2d   : > { %829 = vmatmul.mubr.msk.f32.gmra.mxu1 %vm232_vm0, %v202_v26 }
  0x2e   : > { %831 = vmatprep.mubr.msk.f32.mxu1 %vm906_vm1, %v905_v3 }
  0x2f   : > { %759 = vmatmul.mubr.msk.f32.gmra.mxu0 %vm232_vm0, %v203_v27 }
  0x30   : > { %372 = vmatprep.mubr.f32.mxu0 %v905_v3 }
  0x31   : > { %832 = vmatmul.mubr.msk.f32.gmra.mxu1 %vm232_vm0, %v203_v27 }
  0x32   : > { %834 = vmatprep.mubr.msk.f32.mxu1 %vm906_vm1, %v905_v3 }
  0x33   : > { %760 = vmatmul.mubr.msk.f32.gmra.mxu0 %vm232_vm0, %v204_v28 }
  0x34   : > { %378 = vmatprep.mubr.f32.mxu0 %v905_v3 }
  0x35   : > { %835 = vmatmul.mubr.msk.f32.gmra.mxu1 %vm232_vm0, %v204_v28 }
  0x36   : > { %837 = vmatprep.mubr.msk.f32.mxu1 %vm906_vm1, %v905_v3 }
  0x37   : > { %761 = vmatmul.mubr.msk.f32.gmra.mxu0 %vm232_vm0, %v205_v29 }
  0x38   : > { %384 = vmatprep.mubr.f32.mxu0 %v905_v3 }
  0x39   : > { %838 = vmatmul.mubr.msk.f32.gmra.mxu1 %vm232_vm0, %v205_v29 }
  0x3a   : > { %840 = vmatprep.mubr.msk.f32.mxu1 %vm906_vm1, %v905_v3 }
  0x3b   : > { %762 = vmatmul.mubr.msk.f32.gmra.mxu0 %vm232_vm0, %v206_v30 }
  0x3c   : > { %390 = vmatprep.mubr.f32.mxu0 %v905_v3 }
  0x3d   : > { %841 = vmatmul.mubr.msk.f32.gmra.mxu1 %vm232_vm0, %v206_v30 }
  0x3e   : > { %843 = vmatprep.mubr.msk.f32.mxu1 %vm906_vm1, %v905_v3 }
  0x3f   : > { %763 = vmatmul.mubr.msk.f32.gmra.mxu0 %vm232_vm0, %v207_v31 }
  0x40   : > { %396 = vmatprep.mubr.f32.mxu0 %v905_v3 }
  0x41   : > { %844 = vmatmul.mubr.msk.f32.gmra.mxu1 %vm232_vm0, %v207_v31 }
  0x42   : > { %846 = vmatprep.mubr.msk.f32.mxu1 %vm906_vm1, %v905_v3 }
  0x43   : > { %764 = vmatmul.mubr.msk.f32.gmra.mxu0 %vm232_vm0, %v208_v32 }
  0x44   : > { %402 = vmatprep.mubr.f32.mxu0 %v905_v3 }
  0x45   : > { %847 = vmatmul.mubr.msk.f32.gmra.mxu1 %vm232_vm0, %v208_v32 }
  0x46   : > { %849 = vmatprep.mubr.msk.f32.mxu1 %vm906_vm1, %v905_v3 }
  0x47   : > { %765 = vmatmul.mubr.msk.f32.gmra.mxu0 %vm232_vm0, %v209_v33 }
  0x48   : > { %408 = vmatprep.mubr.f32.mxu0 %v905_v3 }
  0x49   : > { %850 = vmatmul.mubr.msk.f32.gmra.mxu1 %vm232_vm0, %v209_v33 }
  0x4a   : > { %852 = vmatprep.mubr.msk.f32.mxu1 %vm906_vm1, %v905_v3 }
  0x4b   : > { %766 = vmatmul.mubr.msk.f32.gmra.mxu0 %vm232_vm0, %v210_v34 }
  0x4d   : > { %853 = vmatmul.mubr.msk.f32.gmra.mxu1 %vm232_vm0, %v210_v34 }
  0xdb   : > { %v338_v35 = vpop.f32.mrf.mxu0 }
  0xdd   : > { %v340_v36 = vpop.f32.mrf.mxu0  ;;  %v481_v37 = vpop.f32.mrf.mxu1 }
  0xde   : > { %v571_v38 = vmin.f32 %v338_v35, %v340_v36 }
  0xdf   : > { %v344_v39 = vpop.f32.mrf.mxu0  ;;  %v818_v40 = vpop.f32.mrf.mxu1 }
  0xe0   : > { %v584_v41 = vmin.f32 %v571_v38, %v481_v37 }
  0xe1   : > { %v346_v42 = vpop.f32.mrf.mxu0  ;;  %v486_v43 = vpop.f32.mrf.mxu1 }
  0xe2   : > { %v572_v44 = vmin.f32 %v344_v39, %v346_v42  ;;  %626 = vmin.xlane.f32.xlu0 %v584_v41 }
  0xe3   : > { %v350_v45 = vpop.f32.mrf.mxu0  ;;  %v821_v46 = vpop.f32.mrf.mxu1 }
  0xe4   : > { %v585_v47 = vmin.f32 %v572_v44, %v486_v43 }
  0xe5   : > { %v352_v48 = vpop.f32.mrf.mxu0  ;;  %v491_v49 = vpop.f32.mrf.mxu1 }
  0xe6   : > { %v573_v50 = vmin.f32 %v350_v45, %v352_v48  ;;  %628 = vmin.xlane.f32.xlu0 %v585_v47 }
  0xe7   : > { %v356_v51 = vpop.f32.mrf.mxu0  ;;  %v824_v52 = vpop.f32.mrf.mxu1 }
  0xe8   : > { %v586_v53 = vmin.f32 %v573_v50, %v491_v49 }
  0xe9   : > { %v358_v54 = vpop.f32.mrf.mxu0  ;;  %v496_v55 = vpop.f32.mrf.mxu1 }
  0xea   : > { %v574_v56 = vmin.f32 %v356_v51, %v358_v54  ;;  %630 = vmin.xlane.f32.xlu1 %v586_v53 }
  0xeb   : > { %v362_v57 = vpop.f32.mrf.mxu0  ;;  %v827_v58 = vpop.f32.mrf.mxu1 }
  0xec   : > { %v587_v59 = vmin.f32 %v574_v56, %v496_v55 }
  0xed   : > { %v364_v60 = vpop.f32.mrf.mxu0  ;;  %v501_v61 = vpop.f32.mrf.mxu1 }
  0xee   : > { %v575_v62 = vmin.f32 %v362_v57, %v364_v60  ;;  %632 = vmin.xlane.f32.xlu1 %v587_v59 }
  0xef   : > { %v368_v63 = vpop.f32.mrf.mxu0  ;;  %v830_v0 = vpop.f32.mrf.mxu1 }
  0xf0   : > { %v588_v1 = vmin.f32 %v575_v62, %v501_v61 }
  0xf1   : > { %v370_v2 = vpop.f32.mrf.mxu0  ;;  %v506_v3 = vpop.f32.mrf.mxu1 }
  0xf2   : > { %v576_v4 = vmin.f32 %v368_v63, %v370_v2  ;;  %634 = vmin.xlane.f32.xlu0 %v588_v1 }
  0xf3   : > { %v374_v5 = vpop.f32.mrf.mxu0  ;;  %v833_v6 = vpop.f32.mrf.mxu1 }
  0xf4   : > { %v589_v7 = vmin.f32 %v576_v4, %v506_v3 }
  0xf5   : > { %v376_v8 = vpop.f32.mrf.mxu0  ;;  %v511_v9 = vpop.f32.mrf.mxu1 }
  0xf6   : > { %v577_v10 = vmin.f32 %v374_v5, %v376_v8  ;;  %636 = vmin.xlane.f32.xlu1 %v589_v7 }
  0xf7   : > { %v380_v11 = vpop.f32.mrf.mxu0  ;;  %v836_v12 = vpop.f32.mrf.mxu1 }
  0xf8   : > { %v590_v13 = vmin.f32 %v577_v10, %v511_v9 }
  0xf9   : > { %v382_v14 = vpop.f32.mrf.mxu0  ;;  %v516_v15 = vpop.f32.mrf.mxu1 }
  0xfa   : > { %v578_v16 = vmin.f32 %v380_v11, %v382_v14  ;;  %638 = vmin.xlane.f32.xlu0 %v590_v13 }
  0xfb   : > { %v386_v17 = vpop.f32.mrf.mxu0  ;;  %v839_v18 = vpop.f32.mrf.mxu1 }
  0xfc   : > { %v591_v19 = vmin.f32 %v578_v16, %v516_v15 }
  0xfd   : > { %v388_v20 = vpop.f32.mrf.mxu0  ;;  %v521_v21 = vpop.f32.mrf.mxu1 }
  0xfe   : > { %v579_v22 = vmin.f32 %v386_v17, %v388_v20  ;;  %640 = vmin.xlane.f32.xlu1 %v591_v19 }
  0xff   : > { %v392_v23 = vpop.f32.mrf.mxu0  ;;  %v842_v24 = vpop.f32.mrf.mxu1 }
 0x100   : > { %v592_v25 = vmin.f32 %v579_v22, %v521_v21 }
 0x101   : > { %v394_v26 = vpop.f32.mrf.mxu0  ;;  %v526_v27 = vpop.f32.mrf.mxu1 }
 0x102   : > { %v580_v28 = vmin.f32 %v392_v23, %v394_v26  ;;  %642 = vmin.xlane.f32.xlu0 %v592_v25 }
 0x103   : > { %v398_v29 = vpop.f32.mrf.mxu0  ;;  %v845_v30 = vpop.f32.mrf.mxu1 }
 0x104   : > { %v593_v31 = vmin.f32 %v580_v28, %v526_v27 }
 0x105   : > { %v400_v32 = vpop.f32.mrf.mxu0  ;;  %v531_v33 = vpop.f32.mrf.mxu1 }
 0x106   : > { %v581_v34 = vmin.f32 %v398_v29, %v400_v32  ;;  %644 = vmin.xlane.f32.xlu1 %v593_v31 }
 0x107   : > { %v404_v35 = vpop.f32.mrf.mxu0  ;;  %v848_v36 = vpop.f32.mrf.mxu1 }
 0x108   : > { %v594_v37 = vmin.f32 %v581_v34, %v531_v33 }
 0x109   : > { %v406_v38 = vpop.f32.mrf.mxu0  ;;  %v536_v39 = vpop.f32.mrf.mxu1 }
 0x10a   : > { %v582_v40 = vmin.f32 %v404_v35, %v406_v38  ;;  %646 = vmin.xlane.f32.xlu0 %v594_v37 }
 0x10b   : > { %v410_v41 = vpop.f32.mrf.mxu0  ;;  %v851_v42 = vpop.f32.mrf.mxu1 }
 0x10c   : > { %v595_v43 = vmin.f32 %v582_v40, %v536_v39 }
 0x10d   : > { %v412_v44 = vpop.f32.mrf.mxu0  ;;  %v541_v45 = vpop.f32.mrf.mxu1 }
 0x10e   : > { %v583_v46 = vmin.f32 %v410_v41, %v412_v44  ;;  %648 = vmin.xlane.f32.xlu1 %v595_v43 }
 0x10f   : > { %v854_v47 = vpop.f32.mrf.mxu1 }
 0x110   : > { %v596_v48 = vmin.f32 %v583_v46, %v541_v45 }
 0x112   : > { %650 = vmin.xlane.f32.xlu0 %v596_v48 }
 0x16b   : > { %v627_v49 = vpop.xlane.xlu0 %626 }
 0x16c   : > { %653 = vst.msk [vmem:[%s179_s13] sm:$0xff] %vm652_vm2, %v627_v49 }
 0x16f   : > { %v629_v50 = vpop.xlane.xlu0 %628 }
 0x170   : > { %654 = vst.msk [vmem:[%s179_s13 + $0x8] sm:$0xff] %vm652_vm2, %v629_v50 }
 0x173   : > { %v631_v51 = vpop.xlane.xlu1 %630 }
 0x174   : > { %655 = vst.msk [vmem:[%s179_s13 + $0x10] sm:$0xff] %vm652_vm2, %v631_v51 }
 0x177   : > { %v633_v52 = vpop.xlane.xlu1 %632 }
 0x178   : > { %656 = vst.msk [vmem:[%s179_s13 + $0x18] sm:$0xff] %vm652_vm2, %v633_v52 }
 0x17b   : > { %v635_v53 = vpop.xlane.xlu0 %634 }
 0x17c   : > { %657 = vst.msk [vmem:[%s179_s13 + $0x20] sm:$0xff] %vm652_vm2, %v635_v53 }
 0x17f   : > { %v637_v54 = vpop.xlane.xlu1 %636 }
 0x180   : > { %658 = vst.msk [vmem:[%s179_s13 + $0x28] sm:$0xff] %vm652_vm2, %v637_v54 }
 0x183   : > { %v639_v55 = vpop.xlane.xlu0 %638 }
 0x184   : > { %659 = vst.msk [vmem:[%s179_s13 + $0x30] sm:$0xff] %vm652_vm2, %v639_v55 }
 0x187   : > { %v641_v56 = vpop.xlane.xlu1 %640 }
 0x188   : > { %660 = vst.msk [vmem:[%s179_s13 + $0x38] sm:$0xff] %vm652_vm2, %v641_v56 }
 0x18b   : > { %v643_v57 = vpop.xlane.xlu0 %642 }
 0x18c   : > { %661 = vst.msk [vmem:[%s179_s13 + $0x40] sm:$0xff] %vm652_vm2, %v643_v57 }
 0x18f   : > { %v645_v58 = vpop.xlane.xlu1 %644 }
 0x190   : > { %662 = vst.msk [vmem:[%s179_s13 + $0x48] sm:$0xff] %vm652_vm2, %v645_v58 }
 0x193   : > { %v647_v59 = vpop.xlane.xlu0 %646 }
 0x194   : > { %663 = vst.msk [vmem:[%s179_s13 + $0x50] sm:$0xff] %vm652_vm2, %v647_v59 }
 0x197   : > { %v649_v60 = vpop.xlane.xlu1 %648 }
 0x198   : > { %664 = vst.msk [vmem:[%s179_s13 + $0x58] sm:$0xff] %vm652_vm2, %v649_v60 }
 0x19b   : > { %v651_v61 = vpop.xlane.xlu0 %650 }
 0x19c   : > { %665 = vst.msk [vmem:[%s179_s13 + $0x60] sm:$0xff] %vm652_vm2, %v651_v61 }
 0x19d PF: > { %s12_s11 = sadd.s32 1, %s903_s11   ;;  %s1131_s9 = smov %s899_s10 }
 0x19e   : > { %p9_p5 = scmp.ge.s32.totalorder %s12_s11, 4   ;;  %s1132_s10 = smov %s1134_s12 }
 0x1a0   :  { %11 = sbr.rel (!%p9_p5) target bundleno = 2 (0x2), region = 69 }

</bundles_post_ra>
